<compile_context>
chip_gen: v6e
topology: v6e:2x2x1
jax: 0.10.0
libtpu: 0.0.40
codegen_flags: <defaults>
</compile_context>

<pallas_src>
import jax
import jax.numpy as jnp
from jax.experimental import pallas as pl
from jax.experimental.pallas import tpu as pltpu


def _round_up(x, m):
    return (x + m - 1) // m * m


# --------------------------------------------------------------------------
# Fused Pallas kernel: (encoder folded) + concat + Conv1x1Decoder stack
# --------------------------------------------------------------------------
def _make_fused_kernel(depth, exact_gelu):
    """Ref order:
        ev, bl, coords,
        w0_coords, w0_ev_fold, w0_bl_fold, b0_fold,
        [w_i, b_i  for i in 1..depth-1],
        out_ref
    Activation tiles are (C, tile); weights are (C_out, C_in) bf16; biases are
    (C_out, 1) f32 (added after the f32 accumulation).
    """

    def kernel(ev_ref, bl_ref, co_ref,
               w0c_ref, w0e_ref, w0b_ref, b0_ref,
               *rest):
        o_ref = rest[-1]
        wb = rest[:-1]

        ev = ev_ref[...].astype(jnp.bfloat16)
        bl = bl_ref[...].astype(jnp.bfloat16)
        co = co_ref[...].astype(jnp.bfloat16)

        # ---- decoder layer 0 on cat([coords, theta], 1), with the linear
        #      encoder folded in (exact reassociation of W0t @ (We@x + be)).
        h = (jnp.dot(w0c_ref[...], co, preferred_element_type=jnp.float32)
             + jnp.dot(w0e_ref[...], ev, preferred_element_type=jnp.float32)
             + jnp.dot(w0b_ref[...], bl, preferred_element_type=jnp.float32)
             + b0_ref[...])

        # ---- layers 1 .. depth-1: GELU precedes each of the depth-2 middle
        #      convs; the final conv has no activation (matches nn.Sequential).
        for i in range(1, depth):
            if i <= depth - 2:
                if exact_gelu:
                    # Bit-faithful torch erf GELU (f32 VALU polynomial).
                    h = jax.nn.gelu(h, approximate=False)
                else:
                    # tanh-approx GELU in bf16: tanh goes to the EUP slot and
                    # bf16 halves the VALU work on v6e/v7x.
                    h = jax.nn.gelu(h.astype(jnp.bfloat16), approximate=True)
            w = wb[2 * (i - 1)][...]
            b = wb[2 * (i - 1) + 1][...]
            # NOTE: weight LHS carries the contraction dim on lanes, activation
            # RHS on sublanes — the native MXU feed; no relayout expected.
            h = jnp.dot(w, h.astype(jnp.bfloat16),
                        preferred_element_type=jnp.float32) + b

        o_ref[...] = h.astype(o_ref.dtype)

    return kernel


def fused_unet_conv1x1_forward(events, blur_frame, coords, params, *,
                               depth, tile_pixels=8192, exact_gelu=False):
    """events / blur_frame / coords: NCHW float32.  Returns (B, C_out, H, W)."""
    B, c_ev, H, W = events.shape
    c_bl = blur_frame.shape[1]
    c_co = coords.shape[1]
    hw = H * W

    # NCHW -> (B, C, H*W): pure reshape (channel-major already, no transpose),
    # and NO host-side pad — the grid below uses cdiv and Pallas masks the
    # ragged last pixel block (math is pointwise in pixels, OOB writes drop).
    ev = events.reshape(B, c_ev, hw)
    bl = blur_frame.reshape(B, c_bl, hw)
    co = coords.reshape(B, c_co, hw)

    # Pixel tile on the lane axis: multiple of 128 (sweepable).  Per-step VMEM
    # is tiny (channels <= 32), so large tiles are safe even on v7x's 64 MiB.
    tile = _round_up(min(tile_pixels, hw), 128)
    # v7x megacore / pipelining floor: aim for >= 4 total grid steps so both
    # TensorCores get work and input DMA hides behind compute.
    min_steps = 4
    if B * pl.cdiv(hw, tile) < min_steps:
        want_tiles = pl.cdiv(min_steps, B)
        tile = max(128, _round_up(pl.cdiv(hw, want_tiles), 128))
    n_tiles = pl.cdiv(hw, tile)
    grid = (B, n_tiles)

    (w0c, w0e, w0b, b0f, mid_wb) = params
    c_out = mid_wb[-2].shape[0] if mid_wb else w0c.shape[0]

    kernel = _make_fused_kernel(depth, exact_gelu)

    def data_spec(c):
        return pl.BlockSpec((None, c, tile), lambda b, t: (b, 0, t))

    def const_spec(arr):
        return pl.BlockSpec(arr.shape, lambda b, t: (0,) * arr.ndim)

    weight_args = [w0c, w0e, w0b, b0f, *mid_wb]
    in_specs = [data_spec(c_ev), data_spec(c_bl), data_spec(c_co)]
    in_specs += [const_spec(a) for a in weight_args]

    out = pl.pallas_call(
        kernel,
        out_shape=jax.ShapeDtypeStruct((B, c_out, hw), jnp.float32),
        grid_spec=pltpu.PrefetchScalarGridSpec(
            num_scalar_prefetch=0,
            grid=grid,
            in_specs=in_specs,
            out_specs=pl.BlockSpec((None, c_out, tile), lambda b, t: (b, 0, t)),
        ),
        compiler_params=pltpu.CompilerParams(
            dimension_semantics=("parallel", "parallel"),
        ),
    )(ev, bl, co, *weight_args)

    return out.reshape(B, c_out, H, W)


# --------------------------------------------------------------------------
# Module equivalent
# --------------------------------------------------------------------------
class UNetConv1x1WithThetaPallas:
    """decoder_type='conv1x1' (Conv1x1Decoder); linear encoder stand-in (TODO)."""

    def __init__(self, coords_dim, depth, meta_in_channels, meta_out_channels,
                 inr_in_channel, inr_mid_channel, inr_out_channel, key,
                 tile_pixels=8192, exact_gelu=False):
        assert depth >= 2
        assert inr_in_channel == coords_dim + meta_out_channels, (
            "Conv1x1Decoder concatenates coords and theta on the channel axis")
        self.coords_dim = coords_dim
        self.depth = depth
        self.tile_pixels = tile_pixels
        self.exact_gelu = exact_gelu

        keys = jax.random.split(key, depth + 1)

        def init_wb(k, cin, cout):
            # PyTorch Conv2d(kernel_size=1) default init: U(-1/sqrt(cin), 1/sqrt(cin))
            kw, kb = jax.random.split(k)
            scale = 1.0 / jnp.sqrt(cin)
            w_t = jax.random.uniform(kw, (cout, cin), jnp.float32, -scale, scale)
            b = jax.random.uniform(kb, (cout, 1), jnp.float32, -scale, scale)
            return w_t, b  # weight stored transposed: (C_out, C_in)

        # encoder stand-in: single 1x1 conv  meta_in -> meta_out
        self.enc_w_t, self.enc_b = init_wb(keys[0], meta_in_channels,
                                           meta_out_channels)

        # Conv1x1Decoder convs: in->hid, (hid->hid)*(depth-2), hid->out
        dims = [inr_in_channel] + [inr_mid_channel] * (depth - 1) + [inr_out_channel]
        self.dec_w_t, self.dec_b = [], []
        for i in range(depth):
            w_t, b = init_wb(keys[i + 1], dims[i], dims[i + 1])
            self.dec_w_t.append(w_t)
            self.dec_b.append(b)

    def _packed_params(self, c_events):
        """Fold the linear encoder into decoder layer 0 and split both channel
        concats ([events, blur] and [coords, theta]) into separate weights:
            h0 = W0c@co + (W0t@We_ev)@ev + (W0t@We_bl)@bl + (W0t@be + b0)
        Weights cast to bf16 once here; biases stay f32.
        """
        bf = jnp.bfloat16
        we_ev = self.enc_w_t[:, :c_events]
        we_bl = self.enc_w_t[:, c_events:]
        w0 = self.dec_w_t[0]
        w0c = w0[:, :self.coords_dim]
        w0t = w0[:, self.coords_dim:]
        w0e_fold = w0t @ we_ev
        w0b_fold = w0t @ we_bl
        b0_fold = w0t @ self.enc_b + self.dec_b[0]
        mid = []
        for i in range(1, self.depth):
            mid += [self.dec_w_t[i].astype(bf), self.dec_b[i]]
        return (w0c.astype(bf), w0e_fold.astype(bf), w0b_fold.astype(bf),
                b0_fold, mid)

    def forward(self, events, blur_frame):
        # Original: theta = encoder(events, blur); decoder.set_theta(theta);
        # return decoder.  Here the returned callable fuses encoder + concat +
        # the full decoder into one pallas_call (theta never touches HBM).
        params = self._packed_params(events.shape[1])
        depth, tile, exact = self.depth, self.tile_pixels, self.exact_gelu

        def decoder(coords):
            return fused_unet_conv1x1_forward(
                events, blur_frame, coords, params,
                depth=depth, tile_pixels=tile, exact_gelu=exact)

        return decoder


# --------------------------------------------------------------------------
# Pure-JAX reference (unfused, f32, exact-erf GELU) for correctness check
# --------------------------------------------------------------------------
def _reference_forward(model, events, blur_frame, coords):
    def conv1x1(x, w_t, b):
        return (jnp.einsum("oc,bchw->bohw", w_t, x)
                + b[:, 0][None, :, None, None])

    x = jnp.concatenate([events, blur_frame], axis=1)
    theta = conv1x1(x, model.enc_w_t, model.enc_b)
    h = jnp.concatenate([coords, theta], axis=1)
    h = conv1x1(h, model.dec_w_t[0], model.dec_b[0])
    for i in range(1, model.depth):
        if i <= model.depth - 2:
            h = jax.nn.gelu(h, approximate=False)
        h = conv1x1(h, model.dec_w_t[i], model.dec_b[i])
    return h


# --------------------------------------------------------------------------
if __name__ == "__main__":
    key = jax.random.PRNGKey(0)
    k_ev, k_bl, k_co, k_par = jax.random.split(key, 4)

    B, H, W = 2, 16, 16
    events_c, blur_c = 2, 2
    meta_in, meta_out = events_c + blur_c, 30
    coords_dim = 2
    inr_in, inr_mid, inr_out = coords_dim + meta_out, 32, 3
    depth = 4

    events = jax.random.normal(k_ev, (B, events_c, H, W), jnp.float32)
    blur_frame = jax.random.normal(k_bl, (B, blur_c, H, W), jnp.float32)
    coords = jax.random.normal(k_co, (B, coords_dim, H, W), jnp.float32)

    model = UNetConv1x1WithThetaPallas(
        coords_dim=coords_dim, depth=depth,
        meta_in_channels=meta_in, meta_out_channels=meta_out,
        inr_in_channel=inr_in, inr_mid_channel=inr_mid,
        inr_out_channel=inr_out, key=k_par)

    decoder = model.forward(events, blur_frame)   # returns fused decoder
    frame = decoder(coords)                       # (B, inr_out, H, W)
    frame = jax.block_until_ready(frame)
    assert frame.shape == (B, inr_out, H, W)
    assert bool(jnp.all(jnp.isfinite(frame)))

    ref = _reference_forward(model, events, blur_frame, coords)
    max_err = float(jnp.max(jnp.abs(frame - ref)))
    assert jnp.allclose(frame, ref, rtol=5e-2, atol=5e-2), max_err

    print("KERNEL_OK")
</pallas_src>

<mosaic_0001>
module attributes {stable_mosaic.version = 11 : i64} {
  func.func @kernel(%arg0: i32, %arg1: i32, %arg2: memref<1x2x128xf32, #tpu.memory_space<vmem>>, %arg3: memref<1x2x128xf32, #tpu.memory_space<vmem>>, %arg4: memref<1x2x128xf32, #tpu.memory_space<vmem>>, %arg5: memref<32x2xbf16, #tpu.memory_space<vmem>>, %arg6: memref<32x2xbf16, #tpu.memory_space<vmem>>, %arg7: memref<32x2xbf16, #tpu.memory_space<vmem>>, %arg8: memref<32x1xf32, #tpu.memory_space<vmem>>, %arg9: memref<32x32xbf16, #tpu.memory_space<vmem>>, %arg10: memref<32x1xf32, #tpu.memory_space<vmem>>, %arg11: memref<32x32xbf16, #tpu.memory_space<vmem>>, %arg12: memref<32x1xf32, #tpu.memory_space<vmem>>, %arg13: memref<3x32xbf16, #tpu.memory_space<vmem>>, %arg14: memref<3x1xf32, #tpu.memory_space<vmem>>, %arg15: memref<1x3x128xf32, #tpu.memory_space<vmem>>) attributes {dimension_semantics = [#tpu.dimension_semantics<parallel>, #tpu.dimension_semantics<parallel>], iteration_bounds = array<i64: 2, 2>, scalar_prefetch = 0 : i64, scratch_operands = 0 : i64, tpu.core_type = #tpu.core_type<tc>, window_params = [{transform_indices = @transform_0, window_bounds = array<i64: 1, 2, 128>}, {transform_indices = @transform_1, window_bounds = array<i64: 1, 2, 128>}, {transform_indices = @transform_2, window_bounds = array<i64: 1, 2, 128>}, {pipeline_mode = #tpu.pipeline_mode<synchronous>, transform_indices = @transform_3, window_bounds = array<i64: 32, 2>}, {pipeline_mode = #tpu.pipeline_mode<synchronous>, transform_indices = @transform_4, window_bounds = array<i64: 32, 2>}, {pipeline_mode = #tpu.pipeline_mode<synchronous>, transform_indices = @transform_5, window_bounds = array<i64: 32, 2>}, {pipeline_mode = #tpu.pipeline_mode<synchronous>, transform_indices = @transform_6, window_bounds = array<i64: 32, 1>}, {pipeline_mode = #tpu.pipeline_mode<synchronous>, transform_indices = @transform_7, window_bounds = array<i64: 32, 32>}, {pipeline_mode = #tpu.pipeline_mode<synchronous>, transform_indices = @transform_8, window_bounds = array<i64: 32, 1>}, {pipeline_mode = #tpu.pipeline_mode<synchronous>, transform_indices = @transform_9, window_bounds = array<i64: 32, 32>}, {pipeline_mode = #tpu.pipeline_mode<synchronous>, transform_indices = @transform_10, window_bounds = array<i64: 32, 1>}, {pipeline_mode = #tpu.pipeline_mode<synchronous>, transform_indices = @transform_11, window_bounds = array<i64: 3, 32>}, {pipeline_mode = #tpu.pipeline_mode<synchronous>, transform_indices = @transform_12, window_bounds = array<i64: 3, 1>}, {transform_indices = @transform_13, window_bounds = array<i64: 1, 3, 128>}]} {
    %c0 = arith.constant 0 : index
    %c0_0 = arith.constant 0 : index
    %c0_1 = arith.constant 0 : index
    %0 = vector.load %arg2[%c0, %c0_0, %c0_1] : memref<1x2x128xf32, #tpu.memory_space<vmem>>, vector<1x2x128xf32>
    %1 = vector.shape_cast %0 : vector<1x2x128xf32> to vector<2x128xf32>
    %2 = arith.truncf %1 : vector<2x128xf32> to vector<2x128xbf16>
    %c0_2 = arith.constant 0 : index
    %c0_3 = arith.constant 0 : index
    %c0_4 = arith.constant 0 : index
    %3 = vector.load %arg3[%c0_2, %c0_3, %c0_4] : memref<1x2x128xf32, #tpu.memory_space<vmem>>, vector<1x2x128xf32>
    %4 = vector.shape_cast %3 : vector<1x2x128xf32> to vector<2x128xf32>
    %5 = arith.truncf %4 : vector<2x128xf32> to vector<2x128xbf16>
    %c0_5 = arith.constant 0 : index
    %c0_6 = arith.constant 0 : index
    %c0_7 = arith.constant 0 : index
    %6 = vector.load %arg4[%c0_5, %c0_6, %c0_7] : memref<1x2x128xf32, #tpu.memory_space<vmem>>, vector<1x2x128xf32>
    %7 = vector.shape_cast %6 : vector<1x2x128xf32> to vector<2x128xf32>
    %8 = arith.truncf %7 : vector<2x128xf32> to vector<2x128xbf16>
    %c0_8 = arith.constant 0 : index
    %c0_9 = arith.constant 0 : index
    %9 = vector.load %arg5[%c0_8, %c0_9] : memref<32x2xbf16, #tpu.memory_space<vmem>>, vector<32x2xbf16>
    %cst = arith.constant dense<0.000000e+00> : vector<32x128xf32>
    %10 = tpu.matmul %9, %8, %cst {dimension_numbers = #tpu.dot_dimension_numbers<[1], [0], [0], [1], [0, 0, 1, 1], [], []>} : vector<32x2xbf16>, vector<2x128xbf16>, vector<32x128xf32> -> vector<32x128xf32>
    %c0_10 = arith.constant 0 : index
    %c0_11 = arith.constant 0 : index
    %11 = vector.load %arg6[%c0_10, %c0_11] : memref<32x2xbf16, #tpu.memory_space<vmem>>, vector<32x2xbf16>
    %cst_12 = arith.constant dense<0.000000e+00> : vector<32x128xf32>
    %12 = tpu.matmul %11, %2, %cst_12 {dimension_numbers = #tpu.dot_dimension_numbers<[1], [0], [0], [1], [0, 0, 1, 1], [], []>} : vector<32x2xbf16>, vector<2x128xbf16>, vector<32x128xf32> -> vector<32x128xf32>
    %13 = arith.addf %10, %12 : vector<32x128xf32>
    %c0_13 = arith.constant 0 : index
    %c0_14 = arith.constant 0 : index
    %14 = vector.load %arg7[%c0_13, %c0_14] : memref<32x2xbf16, #tpu.memory_space<vmem>>, vector<32x2xbf16>
    %cst_15 = arith.constant dense<0.000000e+00> : vector<32x128xf32>
    %15 = tpu.matmul %14, %5, %cst_15 {dimension_numbers = #tpu.dot_dimension_numbers<[1], [0], [0], [1], [0, 0, 1, 1], [], []>} : vector<32x2xbf16>, vector<2x128xbf16>, vector<32x128xf32> -> vector<32x128xf32>
    %16 = arith.addf %13, %15 : vector<32x128xf32>
    %c0_16 = arith.constant 0 : index
    %c0_17 = arith.constant 0 : index
    %17 = vector.load %arg8[%c0_16, %c0_17] : memref<32x1xf32, #tpu.memory_space<vmem>>, vector<32x1xf32>
    %18 = vector.broadcast %17 : vector<32x1xf32> to vector<32x128xf32>
    %19 = arith.addf %16, %18 : vector<32x128xf32>
    %20 = arith.truncf %19 : vector<32x128xf32> to vector<32x128xbf16>
    %21 = arith.mulf %20, %20 : vector<32x128xbf16>
    %22 = arith.mulf %20, %21 : vector<32x128xbf16>
    %cst_18 = arith.constant 4.467770e-02 : bf16
    %23 = vector.broadcast %cst_18 : bf16 to vector<32x128xbf16>
    %24 = arith.mulf %23, %22 : vector<32x128xbf16>
    %25 = arith.addf %20, %24 : vector<32x128xbf16>
    %cst_19 = arith.constant 7.968750e-01 : bf16
    %26 = vector.broadcast %cst_19 : bf16 to vector<32x128xbf16>
    %27 = arith.mulf %26, %25 : vector<32x128xbf16>
    %28 = math.tanh %27 : vector<32x128xbf16>
    %cst_20 = arith.constant 1.000000e+00 : bf16
    %29 = vector.broadcast %cst_20 : bf16 to vector<32x128xbf16>
    %30 = arith.addf %29, %28 : vector<32x128xbf16>
    %cst_21 = arith.constant 5.000000e-01 : bf16
    %31 = vector.broadcast %cst_21 : bf16 to vector<32x128xbf16>
    %32 = arith.mulf %31, %30 : vector<32x128xbf16>
    %33 = arith.mulf %20, %32 : vector<32x128xbf16>
    %c0_22 = arith.constant 0 : index
    %c0_23 = arith.constant 0 : index
    %34 = vector.load %arg9[%c0_22, %c0_23] : memref<32x32xbf16, #tpu.memory_space<vmem>>, vector<32x32xbf16>
    %c0_24 = arith.constant 0 : index
    %c0_25 = arith.constant 0 : index
    %35 = vector.load %arg10[%c0_24, %c0_25] : memref<32x1xf32, #tpu.memory_space<vmem>>, vector<32x1xf32>
    %cst_26 = arith.constant dense<0.000000e+00> : vector<32x128xf32>
    %36 = tpu.matmul %34, %33, %cst_26 {dimension_numbers = #tpu.dot_dimension_numbers<[1], [0], [0], [1], [0, 0, 1, 1], [], []>} : vector<32x32xbf16>, vector<32x128xbf16>, vector<32x128xf32> -> vector<32x128xf32>
    %37 = vector.broadcast %35 : vector<32x1xf32> to vector<32x128xf32>
    %38 = arith.addf %36, %37 : vector<32x128xf32>
    %39 = arith.truncf %38 : vector<32x128xf32> to vector<32x128xbf16>
    %40 = arith.mulf %39, %39 : vector<32x128xbf16>
    %41 = arith.mulf %39, %40 : vector<32x128xbf16>
    %cst_27 = arith.constant 4.467770e-02 : bf16
    %42 = vector.broadcast %cst_27 : bf16 to vector<32x128xbf16>
    %43 = arith.mulf %42, %41 : vector<32x128xbf16>
    %44 = arith.addf %39, %43 : vector<32x128xbf16>
    %cst_28 = arith.constant 7.968750e-01 : bf16
    %45 = vector.broadcast %cst_28 : bf16 to vector<32x128xbf16>
    %46 = arith.mulf %45, %44 : vector<32x128xbf16>
    %47 = math.tanh %46 : vector<32x128xbf16>
    %cst_29 = arith.constant 1.000000e+00 : bf16
    %48 = vector.broadcast %cst_29 : bf16 to vector<32x128xbf16>
    %49 = arith.addf %48, %47 : vector<32x128xbf16>
    %cst_30 = arith.constant 5.000000e-01 : bf16
    %50 = vector.broadcast %cst_30 : bf16 to vector<32x128xbf16>
    %51 = arith.mulf %50, %49 : vector<32x128xbf16>
    %52 = arith.mulf %39, %51 : vector<32x128xbf16>
    %c0_31 = arith.constant 0 : index
    %c0_32 = arith.constant 0 : index
    %53 = vector.load %arg11[%c0_31, %c0_32] : memref<32x32xbf16, #tpu.memory_space<vmem>>, vector<32x32xbf16>
    %c0_33 = arith.constant 0 : index
    %c0_34 = arith.constant 0 : index
    %54 = vector.load %arg12[%c0_33, %c0_34] : memref<32x1xf32, #tpu.memory_space<vmem>>, vector<32x1xf32>
    %cst_35 = arith.constant dense<0.000000e+00> : vector<32x128xf32>
    %55 = tpu.matmul %53, %52, %cst_35 {dimension_numbers = #tpu.dot_dimension_numbers<[1], [0], [0], [1], [0, 0, 1, 1], [], []>} : vector<32x32xbf16>, vector<32x128xbf16>, vector<32x128xf32> -> vector<32x128xf32>
    %56 = vector.broadcast %54 : vector<32x1xf32> to vector<32x128xf32>
    %57 = arith.addf %55, %56 : vector<32x128xf32>
    %c0_36 = arith.constant 0 : index
    %c0_37 = arith.constant 0 : index
    %58 = vector.load %arg13[%c0_36, %c0_37] : memref<3x32xbf16, #tpu.memory_space<vmem>>, vector<3x32xbf16>
    %c0_38 = arith.constant 0 : index
    %c0_39 = arith.constant 0 : index
    %59 = vector.load %arg14[%c0_38, %c0_39] : memref<3x1xf32, #tpu.memory_space<vmem>>, vector<3x1xf32>
    %60 = arith.truncf %57 : vector<32x128xf32> to vector<32x128xbf16>
    %cst_40 = arith.constant dense<0.000000e+00> : vector<3x128xf32>
    %61 = tpu.matmul %58, %60, %cst_40 {dimension_numbers = #tpu.dot_dimension_numbers<[1], [0], [0], [1], [0, 0, 1, 1], [], []>} : vector<3x32xbf16>, vector<32x128xbf16>, vector<3x128xf32> -> vector<3x128xf32>
    %62 = vector.broadcast %59 : vector<3x1xf32> to vector<3x128xf32>
    %63 = arith.addf %61, %62 : vector<3x128xf32>
    %c0_41 = arith.constant 0 : index
    %c0_42 = arith.constant 0 : index
    %c0_43 = arith.constant 0 : index
    %64 = vector.load %arg15[%c0_41, %c0_42, %c0_43] : memref<1x3x128xf32, #tpu.memory_space<vmem>>, vector<1x3x128xf32>
    %65 = vector.shape_cast %64 : vector<1x3x128xf32> to vector<3x128xf32>
    %66 = vector.shape_cast %63 : vector<3x128xf32> to vector<1x3x128xf32>
    tpu.vector_store %arg15[%c0_41, %c0_42, %c0_43], %66 {strides = array<i32>} : memref<1x3x128xf32, #tpu.memory_space<vmem>>, vector<1x3x128xf32>,
    return
  }
  func.func @transform_0(%arg0: i32, %arg1: i32) -> (i32, i32, i32) {
    %c0_i32 = arith.constant 0 : i32
    %c0_i32_0 = arith.constant 0 : i32
    return %arg0, %c0_i32, %arg1 : i32, i32, i32
  }
  func.func @transform_1(%arg0: i32, %arg1: i32) -> (i32, i32, i32) {
    %c0_i32 = arith.constant 0 : i32
    %c0_i32_0 = arith.constant 0 : i32
    return %arg0, %c0_i32, %arg1 : i32, i32, i32
  }
  func.func @transform_2(%arg0: i32, %arg1: i32) -> (i32, i32, i32) {
    %c0_i32 = arith.constant 0 : i32
    %c0_i32_0 = arith.constant 0 : i32
    return %arg0, %c0_i32, %arg1 : i32, i32, i32
  }
  func.func @transform_3(%arg0: i32, %arg1: i32) -> (i32, i32) {
    %c0_i32 = arith.constant 0 : i32
    %c0_i32_0 = arith.constant 0 : i32
    %c0_i32_1 = arith.constant 0 : i32
    return %c0_i32, %c0_i32_0 : i32, i32
  }
  func.func @transform_4(%arg0: i32, %arg1: i32) -> (i32, i32) {
    %c0_i32 = arith.constant 0 : i32
    %c0_i32_0 = arith.constant 0 : i32
    %c0_i32_1 = arith.constant 0 : i32
    return %c0_i32, %c0_i32_0 : i32, i32
  }
  func.func @transform_5(%arg0: i32, %arg1: i32) -> (i32, i32) {
    %c0_i32 = arith.constant 0 : i32
    %c0_i32_0 = arith.constant 0 : i32
    %c0_i32_1 = arith.constant 0 : i32
    return %c0_i32, %c0_i32_0 : i32, i32
  }
  func.func @transform_6(%arg0: i32, %arg1: i32) -> (i32, i32) {
    %c0_i32 = arith.constant 0 : i32
    %c0_i32_0 = arith.constant 0 : i32
    %c0_i32_1 = arith.constant 0 : i32
    return %c0_i32, %c0_i32_0 : i32, i32
  }
  func.func @transform_7(%arg0: i32, %arg1: i32) -> (i32, i32) {
    %c0_i32 = arith.constant 0 : i32
    %c0_i32_0 = arith.constant 0 : i32
    %c0_i32_1 = arith.constant 0 : i32
    return %c0_i32, %c0_i32_0 : i32, i32
  }
  func.func @transform_8(%arg0: i32, %arg1: i32) -> (i32, i32) {
    %c0_i32 = arith.constant 0 : i32
    %c0_i32_0 = arith.constant 0 : i32
    %c0_i32_1 = arith.constant 0 : i32
    return %c0_i32, %c0_i32_0 : i32, i32
  }
  func.func @transform_9(%arg0: i32, %arg1: i32) -> (i32, i32) {
    %c0_i32 = arith.constant 0 : i32
    %c0_i32_0 = arith.constant 0 : i32
    %c0_i32_1 = arith.constant 0 : i32
    return %c0_i32, %c0_i32_0 : i32, i32
  }
  func.func @transform_10(%arg0: i32, %arg1: i32) -> (i32, i32) {
    %c0_i32 = arith.constant 0 : i32
    %c0_i32_0 = arith.constant 0 : i32
    %c0_i32_1 = arith.constant 0 : i32
    return %c0_i32, %c0_i32_0 : i32, i32
  }
  func.func @transform_11(%arg0: i32, %arg1: i32) -> (i32, i32) {
    %c0_i32 = arith.constant 0 : i32
    %c0_i32_0 = arith.constant 0 : i32
    %c0_i32_1 = arith.constant 0 : i32
    return %c0_i32, %c0_i32_0 : i32, i32
  }
  func.func @transform_12(%arg0: i32, %arg1: i32) -> (i32, i32) {
    %c0_i32 = arith.constant 0 : i32
    %c0_i32_0 = arith.constant 0 : i32
    %c0_i32_1 = arith.constant 0 : i32
    return %c0_i32, %c0_i32_0 : i32, i32
  }
  func.func @transform_13(%arg0: i32, %arg1: i32) -> (i32, i32, i32) {
    %c0_i32 = arith.constant 0 : i32
    %c0_i32_0 = arith.constant 0 : i32
    return %arg0, %c0_i32, %arg1 : i32, i32, i32
  }
}

</mosaic_0001>

<bundles_post_ra>
// kernel: tpu_custom_call.1
= control target key start
LH: loop header
LB: loop body
LE: loop exit
PB: predicated region body
PF: predicated region fallthrough
CT: control target
= control target key end

     0   :  { %s1474_s25 = smov 0   ;;  %s1476_s26 = smov 0   ;;  %s1624_s0 = inlined_call_operand.vmem [shape: f32[2,2,256], index: 0, kind: input, shape index: {}]   ;;  %s1625_s1 = inlined_call_operand.vmem [shape: f32[2,2,256], index: 1, kind: input, shape index: {}]   ;;  %s1626_s2 = inlined_call_operand.vmem [shape: f32[2,2,256], index: 2, kind: input, shape index: {}]   ;;  %s1627_s3 = inlined_call_operand.vmem [shape: bf16[32,2], index: 3, kind: input, shape index: {}]   ;;  %s1628_s4 = inlined_call_operand.vmem [shape: bf16[32,2], index: 4, kind: input, shape index: {}]   ;;  %s1629_s5 = inlined_call_operand.vmem [shape: bf16[32,2], index: 5, kind: input, shape index: {}]   ;;  %s1630_s6 = inlined_call_operand.vmem [shape: f32[32,1], index: 6, kind: input, shape index: {}]   ;;  %s1631_s7 = inlined_call_operand.vmem [shape: bf16[32,32], index: 7, kind: input, shape index: {}]   ;;  %s1632_s8 = inlined_call_operand.vmem [shape: f32[32,1], index: 8, kind: input, shape index: {}]   ;;  %s1633_s9 = inlined_call_operand.vmem [shape: bf16[32,32], index: 9, kind: input, shape index: {}]   ;;  %s1634_s10 = inlined_call_operand.vmem [shape: f32[32,1], index: 10, kind: input, shape index: {}]   ;;  %s1635_s11 = inlined_call_operand.vmem [shape: bf16[3,32], index: 11, kind: input, shape index: {}]   ;;  %s1636_s12 = inlined_call_operand.vmem [shape: f32[3,1], index: 12, kind: input, shape index: {}]   ;;  %s1637_s13 = inlined_call_operand.vmem [shape: f32[2,3,256], index: 13, kind: output, shape index: {}]  }
   0x1   :  { %s1478_s27 = smov 0   ;;  %s1480_s28 = smov 0  }
   0x2   :  { %s1482_s29 = smov 0  }
   0x3 LB: > { %s32_s30 = sadd.s32 1, %s1391_s27  ;;  %s35_s14 = sadd.s32 1, %s1395_s28  ;;  %s1399_s29 = sphi %s1482_s29, %s23_s29   ;;  %s1395_s28 = sphi %s1480_s28, %s1643_s28   ;;  %s1391_s27 = sphi %s1478_s27, %s1642_s27   ;;  %s1387_s26 = sphi %s1476_s26, %s1641_s26   ;;  %s1383_s25 = sphi %s1474_s25, %s1640_s25  }
   0x4   : > { %p33_p0 = scmp.ge.s32.totalorder %s32_s30, 2  ;;  %p1201_p1 = scmp.ge.s32.totalorder %s1399_s29, 1 }
   0x5   : > { %p436_p2 = scmp.lt.s32.totalorder %s1399_s29, 5 }
   0x6   : > { %s1645_s30 = smov (%p33_p0, %s32_s30), 0  ;;  %s1647_s14 = smov (!%p33_p0, %s35_s14), %s1395_s28 }
   0x7   : > { %p437_p3 = pnand %p1201_p1, %p436_p2  ;;  %p37_p4 = scmp.ge.s32.totalorder %s1647_s14, 2 }
   0x8   : > { %p502_p5 = scmp.lt.s32.totalorder (!%p437_p3), %s1387_s26, 1  ;;  %p504_p6 = scmp.lt.s32.totalorder (!%p437_p3), %s1383_s25, 1 }
   0x9   : > { %s1649_s14 = smov (%p37_p4, %s1647_s14), 0  ;;  %440 = sbr.rel (%p437_p3) target bundleno = 923 (0x39b), region = 72 }
   0xa   : > { %1638 = sst [smem:[#allocation2_spill]] %s1649_s14 }
   0xe   : > { %v1343_v0 = vld [vmem:[%s1628_s4] sm:$0xff]   ;;  %vm563_vm0 = vcmask 15360   ;;  %s1651_s26 = smov (!%p502_p5, %s1387_s26), 1  ;;  %s1653_s25 = smov (!%p504_p6, %s1383_s25), 1  ;;  %v769_v2 = vld [vmem:[%s1630_s6 + $0x10] sm:$0xff]  ;;  %v1401_v3 = vmov 0  }
   0xf   : > { %v1344_v1 = vld [vmem:[%s1627_s3] sm:$0xff]   ;;  %1255 = vmatprep.mubr.msk.bf16.mxu0 %vm563_vm0, %v1343_v0  ;;  %s1202_s19 = sshll.u32 %s1651_s26, 1  ;;  %1341 = vset.pattern.permute.xlu0 %v1401_v3  ;;  %vm570_vm1 = vcmask 1040384   ;;  %v1345_v11 = vld [vmem:[%s1628_s4 + $0x8] sm:$0xff]   ;;  %v770_v15 = vld [vmem:[%s1630_s6 + $0x18] sm:$0xff]  ;;  %vm853_vm2 = vcmask 261120  }
  0x10   : > { %1261 = vmatprep.mubr.msk.bf16.mxu1 %vm563_vm0, %v1344_v1  ;;  %s1512_s20 = sadd.s32 %s1202_s19, %s1653_s25  ;;  %1342 = vset.pattern.permute.xlu1 %v1401_v3  ;;  %v767_v4 = vld [vmem:[%s1630_s6] sm:$0xff]  ;;  %v1346_v12 = vld [vmem:[%s1627_s3 + $0x8] sm:$0xff]   ;;  %v821_v19 = vld [vmem:[%s1632_s8 + $0x10] sm:$0xff]  ;;  %vm1403_vm3 = vmmov 0  }
  0x11   : > { %s1203_s21 = sshll.u32 %s1512_s20, 1  ;;  %783 = vperm.xlu0 %1341, %v769_v2   ;;  %773 = vperm.xlu1 %1342, %v767_v4   ;;  %v1347_v14 = vld [vmem:[%s1629_s5] sm:$0xff]   ;;  %v768_v16 = vld [vmem:[%s1630_s6 + $0x8] sm:$0xff]  ;;  %v822_v20 = vld [vmem:[%s1632_s8 + $0x18] sm:$0xff] }
  0x12   : > { %s509_s16 = scalar_lea.vmem %s1624_s0, %s1203_s21  ;;  %s517_s14 = scalar_lea.vmem %s1625_s1, %s1203_s21  ;;  %v1348_v21 = vld [vmem:[%s1629_s5 + $0x8] sm:$0xff]   ;;  %v819_v22 = vld [vmem:[%s1632_s8] sm:$0xff]  ;;  %v935_v24 = vld [vmem:[%s1634_s10 + $0x10] sm:$0xff] }
  0x13   : > { %v539_v5 = vld [vmem:[%s509_s16] sm:$0x3]  ;;  %s525_s23 = scalar_lea.vmem %s1626_s2, %s1203_s21  ;;  %v820_v23 = vld [vmem:[%s1632_s8 + $0x8] sm:$0xff]  ;;  %v936_v25 = vld [vmem:[%s1634_s10 + $0x18] sm:$0xff] }
  0x14   : > { %v541_v6 = vld [vmem:[%s517_s14] sm:$0x3]  ;;  %v540_v7 = vpack.c.bf16 %v539_v5, %v539_v5  ;;  %v934_v27 = vld [vmem:[%s1634_s10 + $0x8] sm:$0xff]  ;;  %s1209_s14 = sshll.u32 %s1512_s20, 2 }
  0x15   : > { %v542_v8 = vpack.c.bf16 %v541_v6, %v541_v6  ;;  %v543_v9 = vld [vmem:[%s525_s23] sm:$0x3]  ;;  %788 = vperm.xlu0 %1341, %v770_v15   ;;  %778 = vperm.xlu1 %1342, %v768_v16   ;;  %s533_s26 = scalar_lea.vmem %s1637_s13, %s1209_s14 }
  0x16   : > { %v544_v10 = vpack.c.bf16 %v543_v9, %v543_v9  ;;  %1295 = vmatprep.subr.msk.bf16.mxu0 %vm570_vm1, %v540_v7  ;;  %v572_v13 = vsel %vm570_vm1, %v540_v7, 0  ;;  %v933_v26 = vld [vmem:[%s1634_s10] sm:$0xff] }
  0x17   : > { %1254 = vmatpush3.bf16.msra.mxu0 %v572_v13  ;;  %v712_v18 = vsel %vm570_vm1, %v542_v8, 0  ;;  %v1023_v28 = vld [vmem:[%s1636_s12] sm:$0x7] }
  0x18   : > { %1296 = vmatprep.subr.msk.bf16.mxu1 %vm570_vm1, %v544_v10  ;;  %v640_v17 = vsel %vm570_vm1, %v544_v10, 0  ;;  %1297 = vmatprep.subr.msk.bf16.mxu0 %vm570_vm1, %v542_v8  ;;  %v1349_v29 = vld [vmem:[%s1631_s7] sm:$0xff]  }
  0x19   : > { %1260 = vmatpush3.bf16.msra.mxu1 %v640_v17  ;;  %835 = vperm.xlu0 %1341, %v821_v19   ;;  %v1351_v15 = vld [vmem:[%s1633_s9] sm:$0xff]  }
  0x1a   : > { %1256 = vmatmul.mubr.msk.bf16.vlgmr.msra.gmra.mxu0 %vm563_vm0, %v1345_v11  ;;  %840 = vperm.xlu1 %1342, %v822_v20  }
  0x1b   : > { %1266 = vmatpush3.bf16.msra.mxu0 %v712_v18  ;;  %1267 = vmatprep.mubr.msk.bf16.mxu0 %vm563_vm0, %v1347_v14  ;;  %v1350_v14 = vld [vmem:[%s1631_s7 + $0x8] sm:$0xff]  }
  0x1c   : > { %1262 = vmatmul.mubr.msk.bf16.vlgmr.msra.gmra.mxu1 %vm563_vm0, %v1346_v12 }
  0x1d   : > { %825 = vperm.xlu0 %1341, %v819_v22   ;;  %1275 = vmatprep.mubr.msk.bf16.mxu1 %vm853_vm2, %v1349_v29 }
  0x1e   : > { %830 = vperm.xlu1 %1342, %v820_v23  }
  0x21   : > { %949 = vperm.xlu0 %1341, %v935_v24  }
  0x22   : > { %1268 = vmatmul.mubr.msk.bf16.vlgmr.msra.gmra.mxu0 %vm563_vm0, %v1348_v21  ;;  %954 = vperm.xlu1 %1342, %v936_v25  }
  0x23   : > { %1283 = vmatprep.mubr.msk.bf16.mxu0 %vm853_vm2, %v1351_v15 }
  0x25   : > { %939 = vperm.xlu0 %1341, %v933_v26  }
  0x26   : > { %944 = vperm.xlu1 %1342, %v934_v27  }
  0x29   : > { %1028 = vperm.xlu0 %1341, %v1023_v28  }
  0x8c   : > { %v784_v37 = vpop.permute.xlu0 %783  ;;  %v774_v39 = vpop.permute.xlu1 %773 }
  0x90   : > { %v789_v50 = vpop.permute.xlu0 %788  ;;  %v779_v55 = vpop.permute.xlu1 %778 }
  0x94   : > { %v836_v16 = vpop.permute.xlu0 %835 }
  0x95   : > { %v841_v17 = vpop.permute.xlu1 %840 }
  0x98   : > { %v826_v21 = vpop.permute.xlu0 %825 }
  0x99   : > { %v831_v24 = vpop.permute.xlu1 %830 }
  0xda   : > { %v1257_v30 = vpop.f32.mrf.mxu0 }
  0xdc   : > { %v1263_v31 = vpop.f32.mrf.mxu1  ;;  %v608_v32 = vpop.f32.mrf.mxu0 }
  0xdd   : > { %v685_v40 = vadd.f32 %v1263_v31, %v1257_v30 }
  0xde   : > { %v676_v33 = vpop.f32.mrf.mxu1  ;;  %v1258_v34 = vpop.f32.mrf.mxu0 }
  0xdf   : > { %v677_v43 = vadd.f32 %v676_v33, %v608_v32 }
  0xe0   : > { %v1264_v35 = vpop.f32.mrf.mxu1  ;;  %v611_v36 = vpop.f32.mrf.mxu0 }
  0xe1   : > { %v688_v44 = vadd.f32 %v1264_v35, %v1258_v34 }
  0xe2   : > { %v1269_v38 = vpop.f32.mrf.mxu0  ;;  %v679_v41 = vpop.f32.mrf.mxu1 }
  0xe3   : > { %v765_v45 = vadd.f32 %v1269_v38, %v685_v40  ;;  %v680_v47 = vadd.f32 %v679_v41, %v611_v36 }
  0xe4   : > { %v748_v42 = vpop.f32.mrf.mxu0 }
  0xe5   : > { %v763_v48 = vadd.f32 %v748_v42, %v677_v43  ;;  %v793_v52 = vadd.f32 %v784_v37, %v765_v45 }
  0xe6   : > { %v1270_v46 = vpop.f32.mrf.mxu0 }
  0xe7   : > { %v766_v49 = vadd.f32 %v1270_v46, %v688_v44  ;;  %v791_v56 = vadd.f32 %v774_v39, %v763_v48  ;;  %v1352_v48 = vld [vmem:[%s1633_s9 + $0x8] sm:$0xff]  }
  0xe8   : > { %v751_v51 = vpop.f32.mrf.mxu0 }
  0xe9   : > { %v794_v53 = vadd.f32 %v789_v50, %v766_v49  ;;  %v764_v54 = vadd.f32 %v751_v51, %v680_v47  ;;  %v1402_v49 = vmov 0.0   ;;  %v955_v50 = vpop.permute.xlu1 %954 }
  0xeb   : > { %v796_v57 = vpack.c.bf16 %v794_v53, %v793_v52  ;;  %v792_v58 = vadd.f32 %v779_v55, %v764_v54  ;;  %v950_v52 = vpop.permute.xlu0 %949 }
  0xed   : > { %v798_v59 = vmul.bf16 %v796_v57, %v796_v57  ;;  %v795_v60 = vpack.c.bf16 %v792_v58, %v791_v56 }
  0xef   : > { %v800_v61 = vmul.bf16 %v798_v59, %v796_v57  ;;  %v797_v62 = vmul.bf16 %v795_v60, %v795_v60 }
  0xf1   : > { %v802_v63 = vmul.bf16 1027030327, %v800_v61  ;;  %v799_v0 = vmul.bf16 %v797_v62, %v795_v60  ;;  %v940_v61 = vpop.permute.xlu0 %939 }
  0xf3   : > { %v801_v1 = vmul.bf16 1027030327, %v799_v0  ;;  %v804_v2 = vadd.bf16 %v802_v63, %v796_v57  ;;  %v1022_v0 = vld [vmem:[%s1635_s11] sm:$0x3] }
  0xf5   : > { %v806_v3 = vmul.bf16 1061961548, %v804_v2  ;;  %v803_v4 = vadd.bf16 %v801_v1, %v795_v60  ;;  %v1029_v1 = vpop.permute.xlu0 %1028 }
  0xf7   : > { %1353 = vtanh.bf16 %v806_v3  ;;  %v805_v5 = vmul.bf16 1061961548, %v803_v4 }
  0xf9   : > { %1355 = vtanh.bf16 %v805_v5 }
 0x105   : > { %v1354_v6 = vpop.eup %1353 }
 0x106   : > { %v810_v7 = vadd.bf16 1065369472, %v1354_v6 }
 0x107   : > { %v1356_v8 = vpop.eup %1355 }
 0x108   : > { %v812_v9 = vmul.bf16 1056980736, %v810_v7  ;;  %v809_v10 = vadd.bf16 1065369472, %v1356_v8 }
 0x10a   : > { %v814_v11 = vmul.bf16 %v812_v9, %v796_v57  ;;  %v811_v12 = vmul.bf16 1056980736, %v809_v10  ;;  %v945_v57 = vpop.permute.xlu1 %944 }
 0x10c   : > { %1271 = vmatprep.subr.bf16.mxu1 %v814_v11  ;;  %v813_v13 = vmul.bf16 %v811_v12, %v795_v60 }
 0x10d   : > { %1272 = vmatpush3.bf16.msra.mxu1 %v814_v11 }
 0x10e   : > { %1273 = vmatprep.subr.bf16.mxu1 %v813_v13 }
 0x111   : > { %1274 = vmatpush3.bf16.msra.mxu1 %v813_v13 }
 0x112   : > { %1287 = vmatprep.subr.bf16.mxu1 %v1402_v49 }
 0x114   : > { %1276 = vmatmul.mubr.msk.bf16.vlgmr.msra.gmra.mxu1 %vm853_vm2, %v1350_v14 }
 0x115   : > { %1291 = vmatprep.mubr.msk.bf16.mxu1 %vm1403_vm3, %v1402_v49 }
 0x1d4   : > { %v1277_v18 = vpop.f32.mrf.mxu1 }
 0x1d5   : > { %v903_v22 = vadd.f32 %v1277_v18, %v836_v16 }
 0x1d6   : > { %v894_v19 = vpop.f32.mrf.mxu1 }
 0x1d7   : > { %v895_v26 = vadd.f32 %v894_v19, %v826_v21 }
 0x1d8   : > { %v1278_v20 = vpop.f32.mrf.mxu1 }
 0x1d9   : > { %v906_v23 = vadd.f32 %v1278_v20, %v841_v17 }
 0x1da   : > { %v897_v25 = vpop.f32.mrf.mxu1 }
 0x1db   : > { %v910_v27 = vpack.c.bf16 %v906_v23, %v903_v22  ;;  %v898_v28 = vadd.f32 %v897_v25, %v831_v24 }
 0x1dd   : > { %v912_v29 = vmul.bf16 %v910_v27, %v910_v27  ;;  %v909_v30 = vpack.c.bf16 %v898_v28, %v895_v26 }
 0x1df   : > { %v914_v31 = vmul.bf16 %v912_v29, %v910_v27  ;;  %v911_v32 = vmul.bf16 %v909_v30, %v909_v30 }
 0x1e1   : > { %v916_v33 = vmul.bf16 1027030327, %v914_v31  ;;  %v913_v34 = vmul.bf16 %v911_v32, %v909_v30 }
 0x1e3   : > { %v918_v35 = vadd.bf16 %v916_v33, %v910_v27  ;;  %v915_v36 = vmul.bf16 1027030327, %v913_v34 }
 0x1e5   : > { %v917_v37 = vadd.bf16 %v915_v36, %v909_v30  ;;  %v920_v38 = vmul.bf16 1061961548, %v918_v35 }
 0x1e7   : > { %1357 = vtanh.bf16 %v920_v38  ;;  %v919_v39 = vmul.bf16 1061961548, %v917_v37 }
 0x1e9   : > { %1359 = vtanh.bf16 %v919_v39 }
 0x1f5   : > { %v1358_v40 = vpop.eup %1357 }
 0x1f6   : > { %v924_v41 = vadd.bf16 1065369472, %v1358_v40 }
 0x1f7   : > { %v1360_v42 = vpop.eup %1359 }
 0x1f8   : > { %v926_v43 = vmul.bf16 1056980736, %v924_v41  ;;  %v923_v44 = vadd.bf16 1065369472, %v1360_v42 }
 0x1fa   : > { %v928_v45 = vmul.bf16 %v926_v43, %v910_v27  ;;  %v925_v46 = vmul.bf16 1056980736, %v923_v44 }
 0x1fc   : > { %1279 = vmatprep.subr.bf16.mxu0 %v928_v45  ;;  %v927_v47 = vmul.bf16 %v925_v46, %v909_v30 }
 0x1fd   : > { %1280 = vmatpush3.bf16.msra.mxu0 %v928_v45 }
 0x1fe   : > { %1281 = vmatprep.subr.bf16.mxu0 %v927_v47 }
 0x201   : > { %1282 = vmatpush3.bf16.msra.mxu0 %v927_v47 }
 0x204   : > { %1284 = vmatmul.mubr.msk.bf16.vlgmr.msra.gmra.mxu0 %vm853_vm2, %v1352_v48 }
 0x2c4   : > { %v1285_v51 = vpop.f32.mrf.mxu0 }
 0x2c5   : > { %v1016_v55 = vadd.f32 %v1285_v51, %v950_v52 }
 0x2c6   : > { %v1007_v53 = vpop.f32.mrf.mxu0 }
 0x2c7   : > { %v1008_v62 = vadd.f32 %v1007_v53, %v940_v61 }
 0x2c8   : > { %v1286_v54 = vpop.f32.mrf.mxu0 }
 0x2c9   : > { %v1019_v56 = vadd.f32 %v1286_v54, %v955_v50 }
 0x2ca   : > { %v1010_v58 = vpop.f32.mrf.mxu0 }
 0x2cb   : > { %v1025_v59 = vpack.c.bf16 %v1019_v56, %v1016_v55  ;;  %v1011_v60 = vadd.f32 %v1010_v58, %v945_v57 }
 0x2cd   : > { %1288 = vmatpush3.bf16.msra.mxu1 %v1025_v59  ;;  %v1024_v63 = vpack.c.bf16 %v1011_v60, %v1008_v62 }
 0x2ce   : > { %1289 = vmatprep.subr.bf16.mxu1 %v1402_v49 }
 0x2d1   : > { %1290 = vmatpush3.bf16.msra.mxu1 %v1024_v63 }
 0x2d4   : > { %1292 = vmatmul.mubr.msk.bf16.vlgmr.msra.gmra.mxu1 %vm853_vm2, %v1022_v0 }
 0x394   : > { %v1068_v2 = vpop.f32.mrf.mxu1 }
 0x395   : > { %v1069_v3 = vadd.f32 %v1068_v2, %v1029_v1 }
 0x396   : > { %v1293_v4 = vpop.f32.mrf.mxu1 }
 0x397   : > { %1074 = vst [vmem:[%s533_s26] sm:$0x7] %v1069_v3 }
 0x398   : > { %v1071_v5 = vpop.f32.mrf.mxu1 }
 0x39a   : > { %v1294_v6 = vpop.f32.mrf.mxu1 }
 0x39b PF: > { %s23_s29 = sadd.s32 1, %s1399_s29   ;;  %s1639_s19 = sld [smem:[#allocation2_spill]] }
 0x39c   : > { %p20_p7 = scmp.ge.s32.totalorder %s23_s29, 6   ;;  %s1640_s25 = smov %s1391_s27 }
 0x39d   : > { %s1641_s26 = smov %s1395_s28  ;;  %s1642_s27 = smov %s1645_s30 }
 0x39e   :  { %22 = sbr.rel (!%p20_p7) target bundleno = 3 (0x3), region = 108 }
 0x3a1   : > { %s1643_s28 = smov %s1639_s19 }

</bundles_post_ra>
